<compile_context>
chip_gen: v7x
topology: tpu7x:2x2x1
jax: 0.10.0
libtpu: 0.0.40
codegen_flags: <defaults>
</compile_context>

<pallas_src>
import functools

import jax
import jax.numpy as jnp
from jax.experimental import pallas as pl
from jax.experimental.pallas import tpu as pltpu

NEG_SLOPE = 0.2       # PyG GATConv default negative_slope
EPS_NORM = 1e-12      # F.normalize eps
MASK_NEG = -1e30      # additive bias for non-edges


# ------------------------------- helpers (in-kernel) -------------------------

def _l2norm_rows(x):
    """x / max(||x||_2, eps) per row, via rsqrt (EUP)."""
    ssq = jnp.sum(x * x, axis=1, keepdims=True)
    return x * jax.lax.rsqrt(jnp.maximum(ssq, EPS_NORM * EPS_NORM))


def _attn_aggregate(bias_ref, hfull_ref, hblk_ref, att_ref, b_ref):
    """One dense single-head GATConv aggregation for a dst-row block.

    bias_ref : [TQ, N]  bf16 additive mask (0 on edges incl. self-loops, -1e30 else)
    hfull_ref: [N, F]   W-transformed features of ALL src nodes (resident)
    hblk_ref : [TQ, F]  W-transformed features of this dst-row block
    att_ref  : [F, 2]   column 0 = a_dst, column 1 = a_src (pre-transposed)
    b_ref    : [1, F]   output bias
    """
    h = hfull_ref[...]
    s_dst = jnp.dot(hblk_ref[...], att_ref[:, 0:1],
                    preferred_element_type=jnp.float32)          # [TQ, 1]
    s_src = jnp.dot(h, att_ref[:, 1:2],
                    preferred_element_type=jnp.float32)          # [N, 1]
    e = s_dst + s_src.T                                          # [TQ, N]
    e = jnp.where(e > 0, e, NEG_SLOPE * e)                       # LeakyReLU
    e = e + bias_ref[...].astype(jnp.float32)                    # mask non-edges
    e = e - jnp.max(e, axis=1, keepdims=True)
    p = jnp.exp(e)
    inv = pl.reciprocal(jnp.sum(p, axis=1, keepdims=True), approx=True)
    attn = p * inv                                               # softmax over src
    return jnp.dot(attn, h, preferred_element_type=jnp.float32) + b_ref[...]


# ---------------------------------- kernels ----------------------------------

def _norm_transform_kernel(x_ref, w_ref, h_ref):
    """h = l2_normalize(x_block) @ W1   (row-local, row-tiled)."""
    h_ref[...] = jnp.dot(_l2norm_rows(x_ref[...]), w_ref[...],
                         preferred_element_type=jnp.float32)


def _gat_relu_next_kernel(bias_ref, hfull_ref, hblk_ref, att_ref, b_ref,
                          wnext_ref, hnext_ref):
    """out = GAT(h); hnext = relu(out) @ W_next   (fused row-local epilogue)."""
    out = _attn_aggregate(bias_ref, hfull_ref, hblk_ref, att_ref, b_ref)
    hnext_ref[...] = jnp.dot(jnp.maximum(out, 0.0), wnext_ref[...],
                             preferred_element_type=jnp.float32)


def _gat_embed_kernel(alpha, n_clusters,
                      bias_ref, hfull_ref, hblk_ref, att_ref, b_ref,
                      wnext_ref, clu_ref,
                      z_ref, hnext_ref, q_ref):
    """Encoder layer 2: z = l2norm(GAT(h)); hnext = z @ W3; q = student-t(z)."""
    z = _l2norm_rows(_attn_aggregate(bias_ref, hfull_ref, hblk_ref,
                                     att_ref, b_ref))
    z_ref[...] = z
    hnext_ref[...] = jnp.dot(z, wnext_ref[...],
                             preferred_element_type=jnp.float32)

    # student-t soft cluster assignment (cluster centers pre-transposed [E, K])
    c = clu_ref[...]
    zn = jnp.sum(z * z, axis=1, keepdims=True)                   # [TQ, 1]
    cn = jnp.sum(c * c, axis=0, keepdims=True)                   # [1, K]
    dist = zn + cn - 2.0 * jnp.dot(z, c, preferred_element_type=jnp.float32)
    dist = jnp.maximum(dist, 0.0)      # guard fp cancellation (dist >= 0)
    q = 1.0 / (1.0 + dist / alpha)
    q = q + 1e-7                       # matches the PyTorch reference
    expo = (alpha + 1.0) / 2.0
    if expo != 1.0:                    # static branch; pow skipped for alpha=1
        q = jnp.power(q, expo)
    # zero-out padded cluster columns before the row normalization
    valid = jax.lax.broadcasted_iota(jnp.int32, q.shape, 1) < n_clusters
    q = jnp.where(valid, q, 0.0)
    q_ref[...] = q / jnp.sum(q, axis=1, keepdims=True)   # exact divide: sum(q)=1


def _gat_out_kernel(bias_ref, hfull_ref, hblk_ref, att_ref, b_ref, o_ref):
    """Final decoder layer: x_hat block."""
    o_ref[...] = _attn_aggregate(bias_ref, hfull_ref, hblk_ref, att_ref, b_ref)


# ------------------------------- host-side glue -------------------------------

def _round_up(v, m):
    return ((v + m - 1) // m) * m


def _pad2(a, rows, cols):
    return jnp.zeros((rows, cols), a.dtype).at[:a.shape[0], :a.shape[1]].set(a)


def _prep_gat(p, fin_p, fout_p):
    """Pre-transpose + zero-pad one GATConv's parameters (done once, on host)."""
    w_t = _pad2(p["w"].T.astype(jnp.float32), fin_p, fout_p)           # [Fin, Fout]
    att = _pad2(jnp.concatenate([p["att_dst"].T, p["att_src"].T], axis=1)
                .astype(jnp.float32), fout_p, 2)                        # [Fout, 2]
    b = _pad2(p["bias"].astype(jnp.float32), 1, fout_p)                 # [1, Fout]
    return w_t, att, b


def _compiler_params(tq, n_pad, f_max):
    # working-set estimate for one aggregation step: double-buffered bf16 mask
    # block, resident h, f32 e/p/attn temporaries, weights, output blocks.
    est = (2 * tq * n_pad * 2
           + 2 * n_pad * f_max * 4
           + 8 * tq * n_pad * 4
           + 4 * f_max * f_max * 4
           + 8 * tq * f_max * 4)
    limit = int(min(max(2 * est, 32 << 20), 100 << 20))
    return pltpu.CompilerParams(
        dimension_semantics=("parallel",),   # row blocks split across TCs (v7x)
        vmem_limit_bytes=limit)


def init_gat_params(key, in_dim, out_dim):
    """Deterministic synthetic parameters for one GATConv(in_dim, out_dim, heads=1)."""
    k_w, k_s, k_d, k_b = jax.random.split(key, 4)
    scale = 1.0 / jnp.sqrt(jnp.float32(in_dim))
    return {
        "w": jax.random.normal(k_w, (out_dim, in_dim), jnp.float32) * scale,
        "att_src": jax.random.normal(k_s, (1, out_dim), jnp.float32) * 0.1,
        "att_dst": jax.random.normal(k_d, (1, out_dim), jnp.float32) * 0.1,
        "bias": jax.random.normal(k_b, (1, out_dim), jnp.float32) * 0.01,
    }


def cdbne_forward(x, edge_index, params, alpha=1.0):
    n, input_dim = x.shape
    hidden_dim = params["gat1"]["w"].shape[0]
    embedding_dim = params["gat2"]["w"].shape[0]
    n_clusters = params["cluster"].shape[0]

    # ---- padded geometry (lane-dense features, (8,128)-friendly row blocks) --
    fin_p = _round_up(input_dim, 128)
    hid_p = _round_up(hidden_dim, 128)
    emb_p = _round_up(embedding_dim, 128)
    k_p = _round_up(n_clusters, 128)
    tq = 128 if n >= 128 else _round_up(n, 8)
    n_pad = _round_up(n, tq)
    grid = (n_pad // tq,)
    cp = _compiler_params(tq, n_pad, max(fin_p, hid_p, emb_p, k_p))

    # ---- additive attention bias (bf16): 0 on edges + self-loops, -1e30 else --
    bias_add = jnp.full((n_pad, n_pad), MASK_NEG, jnp.float32)
    bias_add = bias_add.at[edge_index[1], edge_index[0]].set(0.0)
    idx = jnp.arange(n)
    bias_add = bias_add.at[idx, idx].set(0.0)
    bias_add = bias_add.astype(jnp.bfloat16)

    # ---- padded / pre-transposed parameters ---------------------------------
    x_pad = _pad2(x.astype(jnp.float32), n_pad, fin_p)
    w1t, att1, b1 = _prep_gat(params["gat1"], fin_p, hid_p)
    w2t, att2, b2 = _prep_gat(params["gat2"], hid_p, emb_p)
    w3t, att3, b3 = _prep_gat(params["gat3"], emb_p, hid_p)
    w4t, att4, b4 = _prep_gat(params["gat4"], hid_p, fin_p)
    clu_t = _pad2(params["cluster"].T.astype(jnp.float32), emb_p, k_p)  # [E, K]

    # ---- BlockSpecs ----------------------------------------------------------
    def row_spec(cols):
        return pl.BlockSpec((tq, cols), lambda i: (i, 0))

    def full_spec(shape):
        return pl.BlockSpec(shape, lambda i: (0, 0))

    bias_spec = pl.BlockSpec((tq, n_pad), lambda i: (i, 0))

    # ---- call 1: x-normalize + encoder layer-1 linear transform --------------
    h1 = pl.pallas_call(
        _norm_transform_kernel,
        out_shape=jax.ShapeDtypeStruct((n_pad, hid_p), jnp.float32),
        grid=grid,
        in_specs=[row_spec(fin_p), full_spec((fin_p, hid_p))],
        out_specs=row_spec(hid_p),
        compiler_params=cp,
    )(x_pad, w1t)

    # ---- call 2: encoder GAT1 aggregation + relu + W2 transform ---------------
    h2 = pl.pallas_call(
        _gat_relu_next_kernel,
        out_shape=jax.ShapeDtypeStruct((n_pad, emb_p), jnp.float32),
        grid=grid,
        in_specs=[bias_spec, full_spec((n_pad, hid_p)), row_spec(hid_p),
                  full_spec((hid_p, 2)), full_spec((1, hid_p)),
                  full_spec((hid_p, emb_p))],
        out_specs=row_spec(emb_p),
        compiler_params=cp,
    )(bias_add, h1, h1, att1, b1, w2t)

    # ---- call 3: encoder GAT2 aggregation + normalize -> z, W3 transform, q ---
    z, h3, q = pl.pallas_call(
        functools.partial(_gat_embed_kernel, float(alpha), int(n_clusters)),
        out_shape=(jax.ShapeDtypeStruct((n_pad, emb_p), jnp.float32),
                   jax.ShapeDtypeStruct((n_pad, hid_p), jnp.float32),
                   jax.ShapeDtypeStruct((n_pad, k_p), jnp.float32)),
        grid=grid,
        in_specs=[bias_spec, full_spec((n_pad, emb_p)), row_spec(emb_p),
                  full_spec((emb_p, 2)), full_spec((1, emb_p)),
                  full_spec((emb_p, hid_p)), full_spec((emb_p, k_p))],
        out_specs=(row_spec(emb_p), row_spec(hid_p), row_spec(k_p)),
        compiler_params=cp,
    )(bias_add, h2, h2, att2, b2, w3t, clu_t)

    # ---- call 4: decoder GAT1 aggregation + relu + W4 transform ---------------
    h4 = pl.pallas_call(
        _gat_relu_next_kernel,
        out_shape=jax.ShapeDtypeStruct((n_pad, fin_p), jnp.float32),
        grid=grid,
        in_specs=[bias_spec, full_spec((n_pad, hid_p)), row_spec(hid_p),
                  full_spec((hid_p, 2)), full_spec((1, hid_p)),
                  full_spec((hid_p, fin_p))],
        out_specs=row_spec(fin_p),
        compiler_params=cp,
    )(bias_add, h3, h3, att3, b3, w4t)

    # ---- call 5: decoder GAT2 aggregation -> x_hat ----------------------------
    x_hat = pl.pallas_call(
        _gat_out_kernel,
        out_shape=jax.ShapeDtypeStruct((n_pad, fin_p), jnp.float32),
        grid=grid,
        in_specs=[bias_spec, full_spec((n_pad, fin_p)), row_spec(fin_p),
                  full_spec((fin_p, 2)), full_spec((1, fin_p))],
        out_specs=row_spec(fin_p),
        compiler_params=cp,
    )(bias_add, h4, h4, att4, b4)

    # strip host-side padding
    return (z[:n, :embedding_dim], x_hat[:n, :input_dim], q[:n, :n_clusters])


if __name__ == "__main__":
    # small shapes consistent with the module
    num_nodes = 8
    input_dim = 16
    hidden_dim = 32
    embedding_dim = 8
    n_clusters = 4

    key = jax.random.PRNGKey(0)
    k_x, k1, k2, k3, k4, k_c = jax.random.split(key, 6)

    x = jax.random.normal(k_x, (num_nodes, input_dim), jnp.float32)

    # simple bidirectional ring graph
    src = jnp.arange(num_nodes, dtype=jnp.int32)
    dst = (src + 1) % num_nodes
    edge_index = jnp.stack(
        [jnp.concatenate([src, dst]), jnp.concatenate([dst, src])], axis=0)

    params = {
        "gat1": init_gat_params(k1, input_dim, hidden_dim),
        "gat2": init_gat_params(k2, hidden_dim, embedding_dim),
        "gat3": init_gat_params(k3, embedding_dim, hidden_dim),
        "gat4": init_gat_params(k4, hidden_dim, input_dim),
        "cluster": jax.random.normal(k_c, (n_clusters, embedding_dim),
                                     jnp.float32) * 0.1,
    }

    z, x_hat, q = cdbne_forward(x, edge_index, params, alpha=1.0)
    jax.block_until_ready((z, x_hat, q))

    assert z.shape == (num_nodes, embedding_dim)
    assert x_hat.shape == (num_nodes, input_dim)
    assert q.shape == (num_nodes, n_clusters)
    # sanity: rows of q are a probability distribution, z rows are unit norm
    assert bool(jnp.allclose(jnp.sum(q, axis=1), 1.0, atol=1e-3))
    assert bool(jnp.allclose(jnp.linalg.norm(z, axis=1), 1.0, atol=1e-3))

    print("KERNEL_OK")
</pallas_src>

<mosaic_0001>
module attributes {stable_mosaic.version = 11 : i64} {
  func.func @_norm_transform_kernel(%arg0: i32, %arg1: memref<8x128xf32, #tpu.memory_space<vmem>>, %arg2: memref<128x128xf32, #tpu.memory_space<vmem>>, %arg3: memref<8x128xf32, #tpu.memory_space<vmem>>) attributes {dimension_semantics = [#tpu.dimension_semantics<parallel>], iteration_bounds = array<i64: 1>, scalar_prefetch = 0 : i64, scratch_operands = 0 : i64, tpu.core_type = #tpu.core_type<tc>, window_params = [{transform_indices = @transform_0, window_bounds = array<i64: 8, 128>}, {pipeline_mode = #tpu.pipeline_mode<synchronous>, transform_indices = @transform_1, window_bounds = array<i64: 128, 128>}, {transform_indices = @transform_2, window_bounds = array<i64: 8, 128>}]} {
    %c0 = arith.constant 0 : index
    %c0_0 = arith.constant 0 : index
    %0 = vector.load %arg1[%c0, %c0_0] : memref<8x128xf32, #tpu.memory_space<vmem>>, vector<8x128xf32>
    %1 = arith.mulf %0, %0 : vector<8x128xf32>
    %cst = arith.constant dense<0.000000e+00> : vector<8xf32>
    %2 = vector.multi_reduction <add>, %1, %cst [1] : vector<8x128xf32> to vector<8xf32>
    %3 = vector.shape_cast %2 : vector<8xf32> to vector<8x1xf32>
    %cst_1 = arith.constant 1.000000e-24 : f32
    %4 = vector.broadcast %cst_1 : f32 to vector<8x1xf32>
    %5 = arith.maximumf %3, %4 : vector<8x1xf32>
    %6 = math.rsqrt %5 : vector<8x1xf32>
    %7 = vector.broadcast %6 : vector<8x1xf32> to vector<8x128xf32>
    %8 = arith.mulf %0, %7 : vector<8x128xf32>
    %c0_2 = arith.constant 0 : index
    %c0_3 = arith.constant 0 : index
    %9 = vector.load %arg2[%c0_2, %c0_3] : memref<128x128xf32, #tpu.memory_space<vmem>>, vector<128x128xf32>
    %cst_4 = arith.constant dense<0.000000e+00> : vector<8x128xf32>
    %10 = tpu.matmul %8, %9, %cst_4 {dimension_numbers = #tpu.dot_dimension_numbers<[1], [0], [0], [1], [0, 0, 1, 1], [], []>} : vector<8x128xf32>, vector<128x128xf32>, vector<8x128xf32> -> vector<8x128xf32>
    %c0_5 = arith.constant 0 : index
    %c0_6 = arith.constant 0 : index
    %11 = vector.load %arg3[%c0_5, %c0_6] : memref<8x128xf32, #tpu.memory_space<vmem>>, vector<8x128xf32>
    tpu.vector_store %arg3[%c0_5, %c0_6], %10 {strides = array<i32>} : memref<8x128xf32, #tpu.memory_space<vmem>>, vector<8x128xf32>,
    return
  }
  func.func @transform_0(%arg0: i32) -> (i32, i32) {
    %c0_i32 = arith.constant 0 : i32
    %c0_i32_0 = arith.constant 0 : i32
    return %arg0, %c0_i32 : i32, i32
  }
  func.func @transform_1(%arg0: i32) -> (i32, i32) {
    %c0_i32 = arith.constant 0 : i32
    %c0_i32_0 = arith.constant 0 : i32
    %c0_i32_1 = arith.constant 0 : i32
    return %c0_i32, %c0_i32_0 : i32, i32
  }
  func.func @transform_2(%arg0: i32) -> (i32, i32) {
    %c0_i32 = arith.constant 0 : i32
    %c0_i32_0 = arith.constant 0 : i32
    return %arg0, %c0_i32 : i32, i32
  }
}

</mosaic_0001>

<bundles_post_ra>
// kernel: tpu_custom_call.1
= control target key start
LH: loop header
LB: loop body
LE: loop exit
PB: predicated region body
PF: predicated region fallthrough
CT: control target
= control target key end

     0   :  { %7 = vsyncpa [#allocation3], 0  ;;  %s372_s0 = inlined_call_operand.hbm [shape: f32[8,128], index: 0, kind: input, shape index: {}]   ;;  %s373_s1 = inlined_call_operand.hbm [shape: f32[128,128], index: 1, kind: input, shape index: {}]   ;;  %s374_s2 = inlined_call_operand.hbm [shape: f32[8,128], index: 2, kind: output, shape index: {}]  }
   0x1   :  { %8 = vsyncpa [#allocation6], 0 }
   0x2   :  { %9 = vsyncpa [#allocation4], 0  ;;  %s306_s9 = smov [#allocation2]   ;;  %s307_s11 = smov [#allocation5]  }
   0x3   :  { %s16_s10 = sshll.u32 %s306_s9, 4  ;;  %s25_s12 = sshll.u32 %s307_s11, 4  ;;  %s17_s10 = int_to_ptr.vmem [resolvable:$true] %s16_s10  ;;  %s329_s12 = int_to_ptr.vmem [resolvable:$true] %s25_s12 }
   0x4   :  { %s234_s15 = scalar_lea.hbm %s372_s0, 128 }
   0x5   :  { %p235_p0 = scmp.ne.s32.totalorder %s372_s0, %s234_s15  ;;  %p238_p1 = scmp.lt.u32.totalorder %s234_s15, %s372_s0 }
   0x7   :  { %p240_p2 = pnand %p238_p1, %p235_p0 }
   0x9   :  { %243 = shalt.err (!%p240_p2)
}
   0xa   :  { %s244_s20 = scalar_lea.vmem %s17_s10, 128  ;;  %p249_p4 = scmp.lt.s32.totalorder %s17_s10, %s17_s10 }
   0xb   :  { %p245_p3 = scmp.ne.s32.totalorder %s17_s10, %s244_s20  ;;  %p250_p5 = scmp.lt.s32.totalorder %s244_s20, %s244_s20 }
   0xd   :  { %p251_p6 = por %p250_p5, %p249_p4 }
   0xf   :  { %p252_p7 = pnand %p251_p6, %p245_p3 }
  0x11   :  { %255 = shalt.err (!%p252_p7)
}
  0x12   :  { %19 = dma.hbm_to_vmem [thread:$0]  %s372_s0, 128, %s17_s10, [#allocation3]  }
  0x13   :  { %s256_s25 = scalar_lea.hbm %s373_s1, 2048 }
  0x14   :  { %p257_p8 = scmp.ne.s32.totalorder %s373_s1, %s256_s25  ;;  %p260_p9 = scmp.lt.u32.totalorder %s256_s25, %s373_s1 }
  0x16   :  { %p262_p10 = pnand %p260_p9, %p257_p8 }
  0x18   :  { %265 = shalt.err (!%p262_p10)
}
  0x19   :  { %s266_s30 = scalar_lea.vmem %s329_s12, 2048  ;;  %p271_p12 = scmp.lt.s32.totalorder %s329_s12, %s329_s12 }
  0x1a   :  { %p267_p11 = scmp.ne.s32.totalorder %s329_s12, %s266_s30  ;;  %p272_p13 = scmp.lt.s32.totalorder %s266_s30, %s266_s30 }
  0x1c   :  { %p273_p0 = por %p272_p13, %p271_p12 }
  0x1e   :  { %p274_p1 = pnand %p273_p0, %p267_p11 }
  0x20   :  { %277 = shalt.err (!%p274_p1)
}
  0x21   :  { %s308_s0 = smov 128   ;;  %s309_s3 = smov 8  }
  0x22   :  { %31 = dma.hbm_to_vmem [thread:$0]  %s373_s1, 2048, %s329_s12, [#allocation6], %s308_s0, %s308_s0, %s309_s3  }
  0x23   :  { %300 = dma.done.wait [#allocation3], 128  }
  0x24   :  { %301 = vsyncadd [#allocation3], 4294967168 }
  0x25   :  { %302 = dma.done.wait [#allocation6], 2048  }
  0x26   :  { %303 = vsyncadd [#allocation6], 4294965248  ;;  %v310_v0 = vmov 0.0|0.0   ;;  %v38_v1 = vld [vmem:[#allocation2] sm:$0xff]  ;;  %v45_v2 = vld [vmem:[#allocation5] sm:$0xff]  ;;  %vm311_vm0 = vmmov 0  }
  0x27   :  { %200 = vmatprep.subr.bf16.mxu0 %v310_v0  ;;  %v46_v3 = vld [vmem:[#allocation5 + $0x8] sm:$0xff]  ;;  %v39_v4 = vmul.f32 %v38_v1, %v38_v1  ;;  %v47_v6 = vld [vmem:[#allocation5 + $0x10] sm:$0xff]  ;;  %v48_v7 = vld [vmem:[#allocation5 + $0x18] sm:$0xff]  ;;  %v312_v23 = vmov 0.0   ;;  %s313_s1 = smov [#allocation7]  }
  0x28   :  { %v201_v5 = vpack.c.bf16 %v46_v3, %v45_v2  ;;  %v204_v8 = vpack.c.bf16 %v48_v7, %v47_v6  ;;  %v49_v9 = vld [vmem:[#allocation5 + $0x20] sm:$0xff]  ;;  %v50_v10 = vld [vmem:[#allocation5 + $0x28] sm:$0xff]  ;;  %v51_v12 = vld [vmem:[#allocation5 + $0x30] sm:$0xff]  ;;  %197 = vmatprep.mubr.msk.f32.mxu0 %vm311_vm0, %v312_v23  ;;  %s138_s6 = sshll.u32 %s313_s1, 4  ;;  %s139_s6 = int_to_ptr.vmem [resolvable:$true] %s138_s6 }
  0x29   :  { %40 = vadd.xlane.f32.xlu0 %v39_v4  ;;  %v207_v11 = vpack.c.bf16 %v50_v10, %v49_v9  ;;  %v52_v13 = vld [vmem:[#allocation5 + $0x38] sm:$0xff]  ;;  %v53_v15 = vld [vmem:[#allocation5 + $0x40] sm:$0xff]  ;;  %v54_v16 = vld [vmem:[#allocation5 + $0x48] sm:$0xff]  ;;  %s278_s7 = scalar_lea.vmem %s139_s6, 128  ;;  %p283_p3 = scmp.lt.s32.totalorder %s139_s6, %s139_s6 }
  0x2a   :  { %202 = vmatpush3.bf16.msra.mxu0 %v201_v5  ;;  %v210_v14 = vpack.c.bf16 %v52_v13, %v51_v12  ;;  %v213_v17 = vpack.c.bf16 %v54_v16, %v53_v15  ;;  %v55_v18 = vld [vmem:[#allocation5 + $0x50] sm:$0xff]  ;;  %v56_v19 = vld [vmem:[#allocation5 + $0x58] sm:$0xff]  ;;  %v57_v21 = vld [vmem:[#allocation5 + $0x60] sm:$0xff]  ;;  %p279_p2 = scmp.ne.s32.totalorder %s139_s6, %s278_s7  ;;  %p284_p4 = scmp.lt.s32.totalorder %s278_s7, %s278_s7 }
  0x2b   :  { %203 = vmatprep.subr.bf16.mxu0 %v310_v0  ;;  %v216_v20 = vpack.c.bf16 %v56_v19, %v55_v18  ;;  %v58_v22 = vld [vmem:[#allocation5 + $0x68] sm:$0xff]  ;;  %v59_v25 = vld [vmem:[#allocation5 + $0x70] sm:$0xff]  ;;  %v60_v26 = vld [vmem:[#allocation5 + $0x78] sm:$0xff] }
  0x2c   :  { %v219_v24 = vpack.c.bf16 %v58_v22, %v57_v21  ;;  %v222_v27 = vpack.c.bf16 %v60_v26, %v59_v25  ;;  %p285_p5 = por %p284_p4, %p283_p3 }
  0x2e   :  { %205 = vmatpush3.bf16.msra.mxu0 %v204_v8  ;;  %p286_p6 = pnand %p285_p5, %p279_p2 }
  0x2f   :  { %206 = vmatprep.subr.bf16.mxu0 %v310_v0 }
  0x32   :  { %208 = vmatpush3.bf16.msra.mxu0 %v207_v11 }
  0x33   :  { %209 = vmatprep.subr.bf16.mxu0 %v310_v0 }
  0x36   :  { %211 = vmatpush3.bf16.msra.mxu0 %v210_v14 }
  0x37   :  { %212 = vmatprep.subr.bf16.mxu0 %v310_v0 }
  0x3a   :  { %214 = vmatpush3.bf16.msra.mxu0 %v213_v17 }
  0x3b   :  { %215 = vmatprep.subr.bf16.mxu0 %v310_v0 }
  0x3e   :  { %217 = vmatpush3.bf16.msra.mxu0 %v216_v20 }
  0x3f   :  { %218 = vmatprep.subr.bf16.mxu0 %v310_v0 }
  0x42   :  { %220 = vmatpush3.bf16.msra.mxu0 %v219_v24 }
  0x43   :  { %221 = vmatprep.subr.bf16.mxu0 %v310_v0 }
  0x46   :  { %223 = vmatpush3.bf16.msra.mxu0 %v222_v27 }
  0xb6   :  { %v41_v28 = vpop.xlane.xlu0 %40 }
  0xb7   :  { %v42_v29 = vmax.f32 %v41_v28, 1e-24 }
  0xb9   :  { %232 = vrsqrt.f32 %v42_v29 }
  0xc3   :  { %v233_v30 = vpop.eup %232 }
  0xc4   :  { %v44_v31 = vmul.f32 %v233_v30, %v38_v1 }
  0xc6   :  { %198 = vmatmul.mubr.f32.vlgmr.msra.gmra.mrb[0].mxu0 %v44_v31 }
 0x199   :  { %v127_v32 = vpop.f32.mrb[0].mxu0 }
 0x19a   :  { %131 = vst [vmem:[#allocation7] sm:$0xff] %v127_v32  ;;  %v199_v33 = vpop.f32.mrb[1].mxu0 }
 0x19b   :  { %289 = shalt.err (!%p286_p6)
}
 0x19c   :  { %s290_s10 = scalar_lea.hbm %s374_s2, 128 }
 0x19d   :  { %p291_p7 = scmp.ne.s32.totalorder %s374_s2, %s290_s10  ;;  %p294_p8 = scmp.lt.u32.totalorder %s290_s10, %s374_s2 }
 0x19f   :  { %p296_p9 = pnand %p294_p8, %p291_p7 }
 0x1a1   :  { %299 = shalt.err (!%p296_p9)
}
 0x1a2   :  { %141 = dma.vmem_to_hbm [thread:$0]  %s139_s6, 128, %s374_s2, [#allocation4]  }
 0x1a3   :  { %304 = dma.done.wait [#allocation4], 128  }
 0x1a4   :  { %305 = vsyncadd [#allocation4], 4294967168 }
 0x1a5   :  { %145 = vsyncpa [#allocation3], 1 }
 0x1a6   :  { %146 = vsyncpa [#allocation6], 1 }
 0x1a7   :  { %147 = vsyncpa [#allocation4], 1 }

</bundles_post_ra>
